<compile_context>
chip_gen: v7x
topology: tpu7x:2x2x1
jax: 0.10.0
libtpu: 0.0.40
codegen_flags: <defaults>
</compile_context>

<pallas_src>
import jax
import jax.numpy as jnp
from jax.experimental import pallas as pl
from jax.experimental.pallas import tpu as pltpu

# ---- model / problem sizes (small, consistent with the module) ----
N_NODES = 64          # total nodes across all subgraphs
N_SUB = 16            # number of subgraphs (node_to_subgraph targets)
N_GRAPH = 4           # number of graphs (subgraph_to_graph targets / BN batch)
HIDDEN = 32
OUTPUT_DIM = 16       # stand-in for args.OUTPUT_DIM
NUM_LAYERS = 3        # conv1 + (num_layers - 1) extra GINConv layers
NUM_HOP = 1           # -> z in {0, ..., num_hop}
BN_EPS = 1e-5


def _full_spec(shape):
    nd = len(shape)
    return pl.BlockSpec(shape, lambda *_: (0,) * nd)


# ---------------- fused Pallas kernel ----------------

def _fused_kernel(z_ref, a_ref,
                  w1r_ref, b1_ref, w2_ref, b2_ref,
                  ws1_ref, bs1_ref, ws2_ref, bs2_ref,
                  p_ref, lw1_ref, lb1_ref, lw2_ref, lb2_ref,
                  o_ref):
    a = a_ref[...]                                        # [N, N], resident for all layers

    # ---- conv1: GINConv(eps=0) with scalar input feature ----
    # Lin(1,H) is linear, so (z + A z) @ w1_row + b1 == x0 + A @ x0 + b1
    # with x0 = z * w1_row  (VPU broadcast -- no K=1/K=8 MXU contraction).
    x0 = z_ref[...] * w1r_ref[...]                        # [N, H]
    h = x0 + jnp.dot(a, x0, preferred_element_type=jnp.float32) + b1_ref[...]
    h = jnp.maximum(h, 0.0)
    x = jnp.maximum(
        jnp.dot(h, w2_ref[...], preferred_element_type=jnp.float32) + b2_ref[...], 0.0)

    # ---- remaining GINConv layers (stacked weights, statically unrolled) ----
    for l in range(NUM_LAYERS - 1):
        h = x + jnp.dot(a, x, preferred_element_type=jnp.float32)
        h = jnp.maximum(
            jnp.dot(h, ws1_ref[l], preferred_element_type=jnp.float32) + bs1_ref[l], 0.0)
        x = jnp.maximum(
            jnp.dot(h, ws2_ref[l], preferred_element_type=jnp.float32) + bs2_ref[l], 0.0)

    # ---- double global_add_pool folded into one matmul (P = P2 @ P1, [G, N]) ----
    pooled = jnp.dot(p_ref[...], x, preferred_element_type=jnp.float32)      # [G, H]

    # ---- head: relu(lin1) -> lin2 -> BatchNorm1d(affine=False), batch stats ----
    h = jnp.maximum(
        jnp.dot(pooled, lw1_ref[...], preferred_element_type=jnp.float32) + lb1_ref[...],
        0.0)
    y = jnp.dot(h, lw2_ref[...], preferred_element_type=jnp.float32) + lb2_ref[...]
    mean = jnp.mean(y, axis=0, keepdims=True)
    var = jnp.mean((y - mean) ** 2, axis=0, keepdims=True)   # biased var (BN training)
    o_ref[...] = (y - mean) * jax.lax.rsqrt(var + BN_EPS)


# ---------------- wrapper ----------------

def nested_gin_forward(z, adj, p1, p2, params):
    w1r, b1, w2, b2 = params["conv1"]
    ws1, bs1, ws2, bs2 = params["convs"]
    lw1, lb1, lw2, lb2 = params["head"]

    # Fold the two pooling one-hot matrices into a single [G, N] matrix (static data).
    p = p2 @ p1

    args = (z, adj, w1r, b1, w2, b2, ws1, bs1, ws2, bs2, p, lw1, lb1, lw2, lb2)
    return pl.pallas_call(
        _fused_kernel,
        grid=(1,),
        in_specs=[_full_spec(a.shape) for a in args],
        out_specs=_full_spec((N_GRAPH, OUTPUT_DIM)),
        out_shape=jax.ShapeDtypeStruct((N_GRAPH, OUTPUT_DIM), jnp.float32),
        compiler_params=pltpu.CompilerParams(dimension_semantics=("arbitrary",)),
    )(*args)


# ---------------- pure-JAX reference (original formulation) ----------------

def nested_gin_reference(z, adj, p1, p2, params):
    w1r, b1, w2, b2 = params["conv1"]
    x = z                                           # [N, 1]
    h = x + adj @ x
    h = jnp.maximum(h @ w1r + b1, 0.0)              # Lin(1, H)
    x = jnp.maximum(h @ w2 + b2, 0.0)
    ws1, bs1, ws2, bs2 = params["convs"]
    for l in range(NUM_LAYERS - 1):
        h = x + adj @ x
        h = jnp.maximum(h @ ws1[l] + bs1[l], 0.0)
        x = jnp.maximum(h @ ws2[l] + bs2[l], 0.0)
    x = p2 @ (p1 @ x)
    lw1, lb1, lw2, lb2 = params["head"]
    h = jnp.maximum(x @ lw1 + lb1, 0.0)
    y = h @ lw2 + lb2
    mean = jnp.mean(y, axis=0, keepdims=True)
    var = jnp.mean((y - mean) ** 2, axis=0, keepdims=True)
    return (y - mean) / jnp.sqrt(var + BN_EPS)


# ---------------- params ----------------

def init_params(key):
    def lin(key, fan_in, fan_out):
        kw, kb = jax.random.split(key)
        w = jax.random.normal(kw, (fan_in, fan_out), jnp.float32) * 0.1
        b = jax.random.normal(kb, (1, fan_out), jnp.float32) * 0.1
        return w, b

    keys = jax.random.split(key, 2 * NUM_LAYERS + 2)
    params = {}
    # conv1 MLP: Linear(1, H) (row vector), ReLU, Linear(H, H), ReLU
    w1, b1 = lin(keys[0], 1, HIDDEN)                      # w1: [1, H]
    w2, b2 = lin(keys[1], HIDDEN, HIDDEN)
    params["conv1"] = (w1, b1, w2, b2)
    # remaining convs, stacked along a leading layer axis
    ws1, bs1, ws2, bs2 = [], [], [], []
    for i in range(NUM_LAYERS - 1):
        w1i, b1i = lin(keys[2 + 2 * i], HIDDEN, HIDDEN)
        w2i, b2i = lin(keys[3 + 2 * i], HIDDEN, HIDDEN)
        ws1.append(w1i); bs1.append(b1i); ws2.append(w2i); bs2.append(b2i)
    params["convs"] = (jnp.stack(ws1), jnp.stack(bs1), jnp.stack(ws2), jnp.stack(bs2))
    # lin1 / lin2 (bn2 has affine=False -> no parameters; bn1 is unused in forward)
    lw1, lb1 = lin(keys[-2], HIDDEN, HIDDEN)
    lw2, lb2 = lin(keys[-1], HIDDEN, OUTPUT_DIM)
    params["head"] = (lw1, lb1, lw2, lb2)
    return params


if __name__ == "__main__":
    key = jax.random.PRNGKey(0)
    k_z, k_adj, k_par = jax.random.split(key, 3)

    # data.z: hop labels in {0, ..., num_hop}, shape [N, 1]
    z = jax.random.randint(k_z, (N_NODES, 1), 0, NUM_HOP + 1).astype(jnp.float32)

    # dense symmetric adjacency (edge_index as a 0/1 matrix), no self loops
    u = jax.random.uniform(k_adj, (N_NODES, N_NODES))
    adj = (u < 0.08).astype(jnp.float32)
    adj = jnp.maximum(adj, adj.T)
    adj = adj * (1.0 - jnp.eye(N_NODES, dtype=jnp.float32))

    # node_to_subgraph / subgraph_to_graph as one-hot pooling matrices
    node_to_sub = jnp.arange(N_NODES) // (N_NODES // N_SUB)
    sub_to_graph = jnp.arange(N_SUB) // (N_SUB // N_GRAPH)
    p1 = jax.nn.one_hot(node_to_sub, N_SUB, dtype=jnp.float32).T     # [S, N]
    p2 = jax.nn.one_hot(sub_to_graph, N_GRAPH, dtype=jnp.float32).T  # [G, S]

    params = init_params(k_par)

    out = nested_gin_forward(z, adj, p1, p2, params)
    out = jax.block_until_ready(out)

    ref = nested_gin_reference(z, adj, p1, p2, params)
    max_err = float(jnp.max(jnp.abs(out - ref)))
    assert out.shape == (N_GRAPH, OUTPUT_DIM)
    assert max_err < 1e-2, f"mismatch vs reference: {max_err}"
    print("KERNEL_OK")
</pallas_src>

<mosaic_0001>
module attributes {stable_mosaic.version = 11 : i64} {
  func.func @_fused_kernel(%arg0: i32, %arg1: memref<64x1xf32, #tpu.memory_space<vmem>>, %arg2: memref<64x64xf32, #tpu.memory_space<vmem>>, %arg3: memref<1x32xf32, #tpu.memory_space<vmem>>, %arg4: memref<1x32xf32, #tpu.memory_space<vmem>>, %arg5: memref<32x32xf32, #tpu.memory_space<vmem>>, %arg6: memref<1x32xf32, #tpu.memory_space<vmem>>, %arg7: memref<2x32x32xf32, #tpu.memory_space<vmem>>, %arg8: memref<2x1x32xf32, #tpu.memory_space<vmem>>, %arg9: memref<2x32x32xf32, #tpu.memory_space<vmem>>, %arg10: memref<2x1x32xf32, #tpu.memory_space<vmem>>, %arg11: memref<4x64xf32, #tpu.memory_space<vmem>>, %arg12: memref<32x32xf32, #tpu.memory_space<vmem>>, %arg13: memref<1x32xf32, #tpu.memory_space<vmem>>, %arg14: memref<32x16xf32, #tpu.memory_space<vmem>>, %arg15: memref<1x16xf32, #tpu.memory_space<vmem>>, %arg16: memref<4x16xf32, #tpu.memory_space<vmem>>) attributes {dimension_semantics = [#tpu.dimension_semantics<arbitrary>], iteration_bounds = array<i64: 1>, scalar_prefetch = 0 : i64, scratch_operands = 0 : i64, tpu.core_type = #tpu.core_type<tc>, window_params = [{pipeline_mode = #tpu.pipeline_mode<synchronous>, transform_indices = @transform_0, window_bounds = array<i64: 64, 1>}, {pipeline_mode = #tpu.pipeline_mode<synchronous>, transform_indices = @transform_1, window_bounds = array<i64: 64, 64>}, {pipeline_mode = #tpu.pipeline_mode<synchronous>, transform_indices = @transform_2, window_bounds = array<i64: 1, 32>}, {pipeline_mode = #tpu.pipeline_mode<synchronous>, transform_indices = @transform_3, window_bounds = array<i64: 1, 32>}, {pipeline_mode = #tpu.pipeline_mode<synchronous>, transform_indices = @transform_4, window_bounds = array<i64: 32, 32>}, {pipeline_mode = #tpu.pipeline_mode<synchronous>, transform_indices = @transform_5, window_bounds = array<i64: 1, 32>}, {pipeline_mode = #tpu.pipeline_mode<synchronous>, transform_indices = @transform_6, window_bounds = array<i64: 2, 32, 32>}, {pipeline_mode = #tpu.pipeline_mode<synchronous>, transform_indices = @transform_7, window_bounds = array<i64: 2, 1, 32>}, {pipeline_mode = #tpu.pipeline_mode<synchronous>, transform_indices = @transform_8, window_bounds = array<i64: 2, 32, 32>}, {pipeline_mode = #tpu.pipeline_mode<synchronous>, transform_indices = @transform_9, window_bounds = array<i64: 2, 1, 32>}, {pipeline_mode = #tpu.pipeline_mode<synchronous>, transform_indices = @transform_10, window_bounds = array<i64: 4, 64>}, {pipeline_mode = #tpu.pipeline_mode<synchronous>, transform_indices = @transform_11, window_bounds = array<i64: 32, 32>}, {pipeline_mode = #tpu.pipeline_mode<synchronous>, transform_indices = @transform_12, window_bounds = array<i64: 1, 32>}, {pipeline_mode = #tpu.pipeline_mode<synchronous>, transform_indices = @transform_13, window_bounds = array<i64: 32, 16>}, {pipeline_mode = #tpu.pipeline_mode<synchronous>, transform_indices = @transform_14, window_bounds = array<i64: 1, 16>}, {pipeline_mode = #tpu.pipeline_mode<synchronous>, transform_indices = @transform_15, window_bounds = array<i64: 4, 16>}]} {
    %c0 = arith.constant 0 : index
    %c0_0 = arith.constant 0 : index
    %0 = vector.load %arg2[%c0, %c0_0] : memref<64x64xf32, #tpu.memory_space<vmem>>, vector<64x64xf32>
    %c0_1 = arith.constant 0 : index
    %c0_2 = arith.constant 0 : index
    %1 = vector.load %arg1[%c0_1, %c0_2] : memref<64x1xf32, #tpu.memory_space<vmem>>, vector<64x1xf32>
    %c0_3 = arith.constant 0 : index
    %c0_4 = arith.constant 0 : index
    %2 = vector.load %arg3[%c0_3, %c0_4] : memref<1x32xf32, #tpu.memory_space<vmem>>, vector<1x32xf32>
    %3 = vector.broadcast %1 : vector<64x1xf32> to vector<64x32xf32>
    %4 = vector.broadcast %2 : vector<1x32xf32> to vector<64x32xf32>
    %5 = arith.mulf %3, %4 : vector<64x32xf32>
    %cst = arith.constant dense<0.000000e+00> : vector<64x32xf32>
    %6 = tpu.matmul %0, %5, %cst {dimension_numbers = #tpu.dot_dimension_numbers<[1], [0], [0], [1], [0, 0, 1, 1], [], []>} : vector<64x64xf32>, vector<64x32xf32>, vector<64x32xf32> -> vector<64x32xf32>
    %7 = arith.addf %5, %6 : vector<64x32xf32>
    %c0_5 = arith.constant 0 : index
    %c0_6 = arith.constant 0 : index
    %8 = vector.load %arg4[%c0_5, %c0_6] : memref<1x32xf32, #tpu.memory_space<vmem>>, vector<1x32xf32>
    %9 = vector.broadcast %8 : vector<1x32xf32> to vector<64x32xf32>
    %10 = arith.addf %7, %9 : vector<64x32xf32>
    %cst_7 = arith.constant 0.000000e+00 : f32
    %11 = vector.broadcast %cst_7 : f32 to vector<64x32xf32>
    %12 = arith.maximumf %10, %11 : vector<64x32xf32>
    %c0_8 = arith.constant 0 : index
    %c0_9 = arith.constant 0 : index
    %13 = vector.load %arg5[%c0_8, %c0_9] : memref<32x32xf32, #tpu.memory_space<vmem>>, vector<32x32xf32>
    %cst_10 = arith.constant dense<0.000000e+00> : vector<64x32xf32>
    %14 = tpu.matmul %12, %13, %cst_10 {dimension_numbers = #tpu.dot_dimension_numbers<[1], [0], [0], [1], [0, 0, 1, 1], [], []>} : vector<64x32xf32>, vector<32x32xf32>, vector<64x32xf32> -> vector<64x32xf32>
    %c0_11 = arith.constant 0 : index
    %c0_12 = arith.constant 0 : index
    %15 = vector.load %arg6[%c0_11, %c0_12] : memref<1x32xf32, #tpu.memory_space<vmem>>, vector<1x32xf32>
    %16 = vector.broadcast %15 : vector<1x32xf32> to vector<64x32xf32>
    %17 = arith.addf %14, %16 : vector<64x32xf32>
    %cst_13 = arith.constant 0.000000e+00 : f32
    %18 = vector.broadcast %cst_13 : f32 to vector<64x32xf32>
    %19 = arith.maximumf %17, %18 : vector<64x32xf32>
    %cst_14 = arith.constant dense<0.000000e+00> : vector<64x32xf32>
    %20 = tpu.matmul %0, %19, %cst_14 {dimension_numbers = #tpu.dot_dimension_numbers<[1], [0], [0], [1], [0, 0, 1, 1], [], []>} : vector<64x64xf32>, vector<64x32xf32>, vector<64x32xf32> -> vector<64x32xf32>
    %21 = arith.addf %19, %20 : vector<64x32xf32>
    %c0_15 = arith.constant 0 : index
    %c0_16 = arith.constant 0 : index
    %c0_17 = arith.constant 0 : index
    %22 = vector.load %arg7[%c0_15, %c0_16, %c0_17] : memref<2x32x32xf32, #tpu.memory_space<vmem>>, vector<1x32x32xf32>
    %23 = vector.shape_cast %22 : vector<1x32x32xf32> to vector<32x32xf32>
    %cst_18 = arith.constant dense<0.000000e+00> : vector<64x32xf32>
    %24 = tpu.matmul %21, %23, %cst_18 {dimension_numbers = #tpu.dot_dimension_numbers<[1], [0], [0], [1], [0, 0, 1, 1], [], []>} : vector<64x32xf32>, vector<32x32xf32>, vector<64x32xf32> -> vector<64x32xf32>
    %c0_19 = arith.constant 0 : index
    %c0_20 = arith.constant 0 : index
    %c0_21 = arith.constant 0 : index
    %25 = vector.load %arg8[%c0_19, %c0_20, %c0_21] : memref<2x1x32xf32, #tpu.memory_space<vmem>>, vector<1x1x32xf32>
    %26 = vector.shape_cast %25 : vector<1x1x32xf32> to vector<1x32xf32>
    %27 = vector.broadcast %26 : vector<1x32xf32> to vector<64x32xf32>
    %28 = arith.addf %24, %27 : vector<64x32xf32>
    %cst_22 = arith.constant 0.000000e+00 : f32
    %29 = vector.broadcast %cst_22 : f32 to vector<64x32xf32>
    %30 = arith.maximumf %28, %29 : vector<64x32xf32>
    %c0_23 = arith.constant 0 : index
    %c0_24 = arith.constant 0 : index
    %c0_25 = arith.constant 0 : index
    %31 = vector.load %arg9[%c0_23, %c0_24, %c0_25] : memref<2x32x32xf32, #tpu.memory_space<vmem>>, vector<1x32x32xf32>
    %32 = vector.shape_cast %31 : vector<1x32x32xf32> to vector<32x32xf32>
    %cst_26 = arith.constant dense<0.000000e+00> : vector<64x32xf32>
    %33 = tpu.matmul %30, %32, %cst_26 {dimension_numbers = #tpu.dot_dimension_numbers<[1], [0], [0], [1], [0, 0, 1, 1], [], []>} : vector<64x32xf32>, vector<32x32xf32>, vector<64x32xf32> -> vector<64x32xf32>
    %c0_27 = arith.constant 0 : index
    %c0_28 = arith.constant 0 : index
    %c0_29 = arith.constant 0 : index
    %34 = vector.load %arg10[%c0_27, %c0_28, %c0_29] : memref<2x1x32xf32, #tpu.memory_space<vmem>>, vector<1x1x32xf32>
    %35 = vector.shape_cast %34 : vector<1x1x32xf32> to vector<1x32xf32>
    %36 = vector.broadcast %35 : vector<1x32xf32> to vector<64x32xf32>
    %37 = arith.addf %33, %36 : vector<64x32xf32>
    %cst_30 = arith.constant 0.000000e+00 : f32
    %38 = vector.broadcast %cst_30 : f32 to vector<64x32xf32>
    %39 = arith.maximumf %37, %38 : vector<64x32xf32>
    %cst_31 = arith.constant dense<0.000000e+00> : vector<64x32xf32>
    %40 = tpu.matmul %0, %39, %cst_31 {dimension_numbers = #tpu.dot_dimension_numbers<[1], [0], [0], [1], [0, 0, 1, 1], [], []>} : vector<64x64xf32>, vector<64x32xf32>, vector<64x32xf32> -> vector<64x32xf32>
    %41 = arith.addf %39, %40 : vector<64x32xf32>
    %c1 = arith.constant 1 : index
    %c0_32 = arith.constant 0 : index
    %c0_33 = arith.constant 0 : index
    %42 = vector.load %arg7[%c1, %c0_32, %c0_33] : memref<2x32x32xf32, #tpu.memory_space<vmem>>, vector<1x32x32xf32>
    %43 = vector.shape_cast %42 : vector<1x32x32xf32> to vector<32x32xf32>
    %cst_34 = arith.constant dense<0.000000e+00> : vector<64x32xf32>
    %44 = tpu.matmul %41, %43, %cst_34 {dimension_numbers = #tpu.dot_dimension_numbers<[1], [0], [0], [1], [0, 0, 1, 1], [], []>} : vector<64x32xf32>, vector<32x32xf32>, vector<64x32xf32> -> vector<64x32xf32>
    %c1_35 = arith.constant 1 : index
    %c0_36 = arith.constant 0 : index
    %c0_37 = arith.constant 0 : index
    %45 = vector.load %arg8[%c1_35, %c0_36, %c0_37] : memref<2x1x32xf32, #tpu.memory_space<vmem>>, vector<1x1x32xf32>
    %46 = vector.shape_cast %45 : vector<1x1x32xf32> to vector<1x32xf32>
    %47 = vector.broadcast %46 : vector<1x32xf32> to vector<64x32xf32>
    %48 = arith.addf %44, %47 : vector<64x32xf32>
    %cst_38 = arith.constant 0.000000e+00 : f32
    %49 = vector.broadcast %cst_38 : f32 to vector<64x32xf32>
    %50 = arith.maximumf %48, %49 : vector<64x32xf32>
    %c1_39 = arith.constant 1 : index
    %c0_40 = arith.constant 0 : index
    %c0_41 = arith.constant 0 : index
    %51 = vector.load %arg9[%c1_39, %c0_40, %c0_41] : memref<2x32x32xf32, #tpu.memory_space<vmem>>, vector<1x32x32xf32>
    %52 = vector.shape_cast %51 : vector<1x32x32xf32> to vector<32x32xf32>
    %cst_42 = arith.constant dense<0.000000e+00> : vector<64x32xf32>
    %53 = tpu.matmul %50, %52, %cst_42 {dimension_numbers = #tpu.dot_dimension_numbers<[1], [0], [0], [1], [0, 0, 1, 1], [], []>} : vector<64x32xf32>, vector<32x32xf32>, vector<64x32xf32> -> vector<64x32xf32>
    %c1_43 = arith.constant 1 : index
    %c0_44 = arith.constant 0 : index
    %c0_45 = arith.constant 0 : index
    %54 = vector.load %arg10[%c1_43, %c0_44, %c0_45] : memref<2x1x32xf32, #tpu.memory_space<vmem>>, vector<1x1x32xf32>
    %55 = vector.shape_cast %54 : vector<1x1x32xf32> to vector<1x32xf32>
    %56 = vector.broadcast %55 : vector<1x32xf32> to vector<64x32xf32>
    %57 = arith.addf %53, %56 : vector<64x32xf32>
    %cst_46 = arith.constant 0.000000e+00 : f32
    %58 = vector.broadcast %cst_46 : f32 to vector<64x32xf32>
    %59 = arith.maximumf %57, %58 : vector<64x32xf32>
    %c0_47 = arith.constant 0 : index
    %c0_48 = arith.constant 0 : index
    %60 = vector.load %arg11[%c0_47, %c0_48] : memref<4x64xf32, #tpu.memory_space<vmem>>, vector<4x64xf32>
    %cst_49 = arith.constant dense<0.000000e+00> : vector<4x32xf32>
    %61 = tpu.matmul %60, %59, %cst_49 {dimension_numbers = #tpu.dot_dimension_numbers<[1], [0], [0], [1], [0, 0, 1, 1], [], []>} : vector<4x64xf32>, vector<64x32xf32>, vector<4x32xf32> -> vector<4x32xf32>
    %c0_50 = arith.constant 0 : index
    %c0_51 = arith.constant 0 : index
    %62 = vector.load %arg12[%c0_50, %c0_51] : memref<32x32xf32, #tpu.memory_space<vmem>>, vector<32x32xf32>
    %cst_52 = arith.constant dense<0.000000e+00> : vector<4x32xf32>
    %63 = tpu.matmul %61, %62, %cst_52 {dimension_numbers = #tpu.dot_dimension_numbers<[1], [0], [0], [1], [0, 0, 1, 1], [], []>} : vector<4x32xf32>, vector<32x32xf32>, vector<4x32xf32> -> vector<4x32xf32>
    %c0_53 = arith.constant 0 : index
    %c0_54 = arith.constant 0 : index
    %64 = vector.load %arg13[%c0_53, %c0_54] : memref<1x32xf32, #tpu.memory_space<vmem>>, vector<1x32xf32>
    %65 = vector.broadcast %64 : vector<1x32xf32> to vector<4x32xf32>
    %66 = arith.addf %63, %65 : vector<4x32xf32>
    %cst_55 = arith.constant 0.000000e+00 : f32
    %67 = vector.broadcast %cst_55 : f32 to vector<4x32xf32>
    %68 = arith.maximumf %66, %67 : vector<4x32xf32>
    %c0_56 = arith.constant 0 : index
    %c0_57 = arith.constant 0 : index
    %69 = vector.load %arg14[%c0_56, %c0_57] : memref<32x16xf32, #tpu.memory_space<vmem>>, vector<32x16xf32>
    %cst_58 = arith.constant dense<0.000000e+00> : vector<4x16xf32>
    %70 = tpu.matmul %68, %69, %cst_58 {dimension_numbers = #tpu.dot_dimension_numbers<[1], [0], [0], [1], [0, 0, 1, 1], [], []>} : vector<4x32xf32>, vector<32x16xf32>, vector<4x16xf32> -> vector<4x16xf32>
    %c0_59 = arith.constant 0 : index
    %c0_60 = arith.constant 0 : index
    %71 = vector.load %arg15[%c0_59, %c0_60] : memref<1x16xf32, #tpu.memory_space<vmem>>, vector<1x16xf32>
    %72 = vector.broadcast %71 : vector<1x16xf32> to vector<4x16xf32>
    %73 = arith.addf %70, %72 : vector<4x16xf32>
    %cst_61 = arith.constant dense<0.000000e+00> : vector<16xf32>
    %74 = vector.multi_reduction <add>, %73, %cst_61 [0] : vector<4x16xf32> to vector<16xf32>
    %75 = vector.shape_cast %74 : vector<16xf32> to vector<1x16xf32>
    %cst_62 = arith.constant 4.000000e+00 : f32
    %76 = vector.broadcast %cst_62 : f32 to vector<1x16xf32>
    %77 = arith.divf %75, %76 : vector<1x16xf32>
    %78 = vector.broadcast %77 : vector<1x16xf32> to vector<4x16xf32>
    %79 = arith.subf %73, %78 : vector<4x16xf32>
    %80 = arith.mulf %79, %79 : vector<4x16xf32>
    %cst_63 = arith.constant dense<0.000000e+00> : vector<16xf32>
    %81 = vector.multi_reduction <add>, %80, %cst_63 [0] : vector<4x16xf32> to vector<16xf32>
    %82 = vector.shape_cast %81 : vector<16xf32> to vector<1x16xf32>
    %cst_64 = arith.constant 4.000000e+00 : f32
    %83 = vector.broadcast %cst_64 : f32 to vector<1x16xf32>
    %84 = arith.divf %82, %83 : vector<1x16xf32>
    %85 = vector.broadcast %77 : vector<1x16xf32> to vector<4x16xf32>
    %86 = arith.subf %73, %85 : vector<4x16xf32>
    %cst_65 = arith.constant 9.99999974E-6 : f32
    %87 = vector.broadcast %cst_65 : f32 to vector<1x16xf32>
    %88 = arith.addf %84, %87 : vector<1x16xf32>
    %89 = math.rsqrt %88 : vector<1x16xf32>
    %90 = vector.broadcast %89 : vector<1x16xf32> to vector<4x16xf32>
    %91 = arith.mulf %86, %90 : vector<4x16xf32>
    %c0_66 = arith.constant 0 : index
    %c0_67 = arith.constant 0 : index
    %92 = vector.load %arg16[%c0_66, %c0_67] : memref<4x16xf32, #tpu.memory_space<vmem>>, vector<4x16xf32>
    tpu.vector_store %arg16[%c0_66, %c0_67], %91 {strides = array<i32>} : memref<4x16xf32, #tpu.memory_space<vmem>>, vector<4x16xf32>,
    return
  }
  func.func @transform_0(%arg0: i32) -> (i32, i32) {
    %c0_i32 = arith.constant 0 : i32
    %c0_i32_0 = arith.constant 0 : i32
    %c0_i32_1 = arith.constant 0 : i32
    return %c0_i32, %c0_i32_0 : i32, i32
  }
  func.func @transform_1(%arg0: i32) -> (i32, i32) {
    %c0_i32 = arith.constant 0 : i32
    %c0_i32_0 = arith.constant 0 : i32
    %c0_i32_1 = arith.constant 0 : i32
    return %c0_i32, %c0_i32_0 : i32, i32
  }
  func.func @transform_2(%arg0: i32) -> (i32, i32) {
    %c0_i32 = arith.constant 0 : i32
    %c0_i32_0 = arith.constant 0 : i32
    %c0_i32_1 = arith.constant 0 : i32
    return %c0_i32, %c0_i32_0 : i32, i32
  }
  func.func @transform_3(%arg0: i32) -> (i32, i32) {
    %c0_i32 = arith.constant 0 : i32
    %c0_i32_0 = arith.constant 0 : i32
    %c0_i32_1 = arith.constant 0 : i32
    return %c0_i32, %c0_i32_0 : i32, i32
  }
  func.func @transform_4(%arg0: i32) -> (i32, i32) {
    %c0_i32 = arith.constant 0 : i32
    %c0_i32_0 = arith.constant 0 : i32
    %c0_i32_1 = arith.constant 0 : i32
    return %c0_i32, %c0_i32_0 : i32, i32
  }
  func.func @transform_5(%arg0: i32) -> (i32, i32) {
    %c0_i32 = arith.constant 0 : i32
    %c0_i32_0 = arith.constant 0 : i32
    %c0_i32_1 = arith.constant 0 : i32
    return %c0_i32, %c0_i32_0 : i32, i32
  }
  func.func @transform_6(%arg0: i32) -> (i32, i32, i32) {
    %c0_i32 = arith.constant 0 : i32
    %c0_i32_0 = arith.constant 0 : i32
    %c0_i32_1 = arith.constant 0 : i32
    %c0_i32_2 = arith.constant 0 : i32
    return %c0_i32, %c0_i32_0, %c0_i32_1 : i32, i32, i32
  }
  func.func @transform_7(%arg0: i32) -> (i32, i32, i32) {
    %c0_i32 = arith.constant 0 : i32
    %c0_i32_0 = arith.constant 0 : i32
    %c0_i32_1 = arith.constant 0 : i32
    %c0_i32_2 = arith.constant 0 : i32
    return %c0_i32, %c0_i32_0, %c0_i32_1 : i32, i32, i32
  }
  func.func @transform_8(%arg0: i32) -> (i32, i32, i32) {
    %c0_i32 = arith.constant 0 : i32
    %c0_i32_0 = arith.constant 0 : i32
    %c0_i32_1 = arith.constant 0 : i32
    %c0_i32_2 = arith.constant 0 : i32
    return %c0_i32, %c0_i32_0, %c0_i32_1 : i32, i32, i32
  }
  func.func @transform_9(%arg0: i32) -> (i32, i32, i32) {
    %c0_i32 = arith.constant 0 : i32
    %c0_i32_0 = arith.constant 0 : i32
    %c0_i32_1 = arith.constant 0 : i32
    %c0_i32_2 = arith.constant 0 : i32
    return %c0_i32, %c0_i32_0, %c0_i32_1 : i32, i32, i32
  }
  func.func @transform_10(%arg0: i32) -> (i32, i32) {
    %c0_i32 = arith.constant 0 : i32
    %c0_i32_0 = arith.constant 0 : i32
    %c0_i32_1 = arith.constant 0 : i32
    return %c0_i32, %c0_i32_0 : i32, i32
  }
  func.func @transform_11(%arg0: i32) -> (i32, i32) {
    %c0_i32 = arith.constant 0 : i32
    %c0_i32_0 = arith.constant 0 : i32
    %c0_i32_1 = arith.constant 0 : i32
    return %c0_i32, %c0_i32_0 : i32, i32
  }
  func.func @transform_12(%arg0: i32) -> (i32, i32) {
    %c0_i32 = arith.constant 0 : i32
    %c0_i32_0 = arith.constant 0 : i32
    %c0_i32_1 = arith.constant 0 : i32
    return %c0_i32, %c0_i32_0 : i32, i32
  }
  func.func @transform_13(%arg0: i32) -> (i32, i32) {
    %c0_i32 = arith.constant 0 : i32
    %c0_i32_0 = arith.constant 0 : i32
    %c0_i32_1 = arith.constant 0 : i32
    return %c0_i32, %c0_i32_0 : i32, i32
  }
  func.func @transform_14(%arg0: i32) -> (i32, i32) {
    %c0_i32 = arith.constant 0 : i32
    %c0_i32_0 = arith.constant 0 : i32
    %c0_i32_1 = arith.constant 0 : i32
    return %c0_i32, %c0_i32_0 : i32, i32
  }
  func.func @transform_15(%arg0: i32) -> (i32, i32) {
    %c0_i32 = arith.constant 0 : i32
    %c0_i32_0 = arith.constant 0 : i32
    %c0_i32_1 = arith.constant 0 : i32
    return %c0_i32, %c0_i32_0 : i32, i32
  }
}

</mosaic_0001>

<bundles_post_ra>
// kernel: tpu_custom_call.1
= control target key start
LH: loop header
LB: loop body
LE: loop exit
PB: predicated region body
PF: predicated region fallthrough
CT: control target
= control target key end

     0   :  { %20 = vsyncpa [#allocation3], 0  ;;  %s2796_s0 = inlined_call_operand.vmem [shape: f32[64,1], index: 0, kind: input, shape index: {}]   ;;  %s2797_s1 = inlined_call_operand.vmem [shape: f32[64,64], index: 1, kind: input, shape index: {}]   ;;  %s2798_s2 = inlined_call_operand.hbm [shape: f32[1,32], index: 2, kind: input, shape index: {}]   ;;  %s2799_s3 = inlined_call_operand.hbm [shape: f32[1,32], index: 3, kind: input, shape index: {}]   ;;  %s2800_s4 = inlined_call_operand.hbm [shape: f32[32,32], index: 4, kind: input, shape index: {}]   ;;  %s2801_s5 = inlined_call_operand.hbm [shape: f32[1,32], index: 5, kind: input, shape index: {}]   ;;  %s2802_s6 = inlined_call_operand.vmem [shape: f32[2,32,32], index: 6, kind: input, shape index: {}]   ;;  %s2803_s7 = inlined_call_operand.vmem [shape: f32[2,1,32], index: 7, kind: input, shape index: {}]   ;;  %s2804_s8 = inlined_call_operand.hbm [shape: f32[2,32,32], index: 8, kind: input, shape index: {}]   ;;  %s2805_s9 = inlined_call_operand.hbm [shape: f32[2,1,32], index: 9, kind: input, shape index: {}]   ;;  %s2806_s10 = inlined_call_operand.vmem [shape: f32[4,64], index: 10, kind: input, shape index: {}]   ;;  %s2807_s11 = inlined_call_operand.hbm [shape: f32[32,32], index: 11, kind: input, shape index: {}]   ;;  %s2808_s12 = inlined_call_operand.vmem [shape: f32[1,32], index: 12, kind: input, shape index: {}]   ;;  %s2809_s13 = inlined_call_operand.vmem [shape: f32[32,16], index: 13, kind: input, shape index: {}]   ;;  %s2810_s14 = inlined_call_operand.vmem [shape: f32[1,16], index: 14, kind: input, shape index: {}]   ;;  %s2811_s15 = inlined_call_operand.hbm [shape: f32[4,16], index: 15, kind: output, shape index: {}]  }
   0x1   :  { %21 = vsyncpa [#allocation6], 0 }
   0x2   :  { %22 = vsyncpa [#allocation9], 0 }
   0x3   :  { %23 = vsyncpa [#allocation12], 0 }
   0x4   :  { %24 = vsyncpa [#allocation4], 0  ;;  %s2379_s18 = smov [#allocation5]   ;;  %s2380_s20 = smov [#allocation8]  }
   0x5   :  { %s45_s19 = sshll.u32 %s2379_s18, 4  ;;  %s67_s21 = sshll.u32 %s2380_s20, 4  ;;  %s46_s19 = int_to_ptr.vmem [resolvable:$true] %s45_s19  ;;  %s68_s21 = int_to_ptr.vmem [resolvable:$true] %s67_s21 }
   0x6   :  { %s2193_s24 = scalar_lea.hbm %s2799_s3, 16 }
   0x7   :  { %p2194_p0 = scmp.ne.s32.totalorder %s2799_s3, %s2193_s24  ;;  %p2197_p1 = scmp.lt.u32.totalorder %s2193_s24, %s2799_s3 }
   0x9   :  { %p2199_p2 = pnand %p2197_p1, %p2194_p0 }
   0xb   :  { %2202 = shalt.err (!%p2199_p2)
}
   0xc   :  { %s2203_s29 = scalar_lea.vmem %s46_s19, 16  ;;  %s2207_s30 = scalar_lea.vmem %s46_s19, 32 }
   0xd   :  { %p2204_p3 = scmp.ne.s32.totalorder %s46_s19, %s2203_s29  ;;  %p2208_p4 = scmp.lt.s32.totalorder %s46_s19, %s46_s19 }
   0xe   :  { %p2209_p5 = scmp.lt.s32.totalorder %s2207_s30, %s2203_s29 }
  0x10   :  { %p2210_p6 = por %p2209_p5, %p2208_p4 }
  0x12   :  { %p2211_p7 = pnand %p2210_p6, %p2204_p3 }
  0x14   :  { %2214 = shalt.err (!%p2211_p7)
}
  0x15   :  { %48 = dma.hbm_to_vmem [thread:$0]  %s2799_s3, 16, %s46_s19, [#allocation6]  }
  0x16   :  { %s2215_s22 = scalar_lea.hbm %s2801_s5, 16 }
  0x17   :  { %p2216_p8 = scmp.ne.s32.totalorder %s2801_s5, %s2215_s22  ;;  %p2219_p9 = scmp.lt.u32.totalorder %s2215_s22, %s2801_s5 }
  0x19   :  { %p2221_p10 = pnand %p2219_p9, %p2216_p8 }
  0x1b   :  { %2224 = shalt.err (!%p2221_p10)
}
  0x1c   :  { %s2225_s27 = scalar_lea.vmem %s68_s21, 16  ;;  %s2229_s28 = scalar_lea.vmem %s68_s21, 32 }
  0x1d   :  { %p2226_p11 = scmp.ne.s32.totalorder %s68_s21, %s2225_s27  ;;  %p2230_p12 = scmp.lt.s32.totalorder %s68_s21, %s68_s21 }
  0x1e   :  { %p2231_p13 = scmp.lt.s32.totalorder %s2229_s28, %s2225_s27 }
  0x20   :  { %p2232_p0 = por %p2231_p13, %p2230_p12 }
  0x22   :  { %p2233_p1 = pnand %p2232_p0, %p2226_p11 }
  0x24   :  { %2236 = shalt.err (!%p2233_p1)
}
  0x25   :  { %70 = dma.hbm_to_vmem [thread:$0]  %s2801_s5, 16, %s68_s21, [#allocation9]  }
  0x26   :  { %s2381_s29 = smov [#allocation11]   ;;  %s2237_s18 = scalar_lea.hbm %s2805_s9, 32 }
  0x27   :  { %s92_s30 = sshll.u32 %s2381_s29, 4  ;;  %p2238_p2 = scmp.ne.s32.totalorder %s2805_s9, %s2237_s18  ;;  %s93_s30 = int_to_ptr.vmem [resolvable:$true] %s92_s30 }
  0x28   :  { %p2241_p3 = scmp.lt.u32.totalorder %s2237_s18, %s2805_s9 }
  0x2a   :  { %p2243_p4 = pnand %p2241_p3, %p2238_p2 }
  0x2c   :  { %2246 = shalt.err (!%p2243_p4)
}
  0x2d   :  { %s2247_s25 = scalar_lea.vmem %s93_s30, 32  ;;  %p2252_p6 = scmp.lt.s32.totalorder %s93_s30, %s93_s30 }
  0x2e   :  { %p2248_p5 = scmp.ne.s32.totalorder %s93_s30, %s2247_s25  ;;  %p2253_p7 = scmp.lt.s32.totalorder %s2247_s25, %s2247_s25 }
  0x30   :  { %p2254_p8 = por %p2253_p7, %p2252_p6 }
  0x32   :  { %p2255_p9 = pnand %p2254_p8, %p2248_p5 }
  0x34   :  { %2258 = shalt.err (!%p2255_p9)
}
  0x35   :  { %s2382_s5 = smov 16   ;;  %s2383_s21 = smov 1  }
  0x36   :  { %98 = dma.hbm_to_vmem [thread:$0]  %s2805_s9, 32, %s93_s30, [#allocation12], %s2382_s5, %s2382_s5, %s2383_s21  }
  0x37   :  { %s2384_s28 = smov [#allocation2]   ;;  %s2385_s19 = smov [#allocation7]  }
  0x38   :  { %s35_s3 = sshll.u32 %s2384_s28, 4  ;;  %s54_s29 = sshll.u32 %s2385_s19, 4  ;;  %s36_s3 = int_to_ptr.vmem [resolvable:$true] %s35_s3  ;;  %s55_s29 = int_to_ptr.vmem [resolvable:$true] %s54_s29 }
  0x39   :  { %s2259_s18 = scalar_lea.hbm %s2798_s2, 16 }
  0x3a   :  { %p2260_p10 = scmp.ne.s32.totalorder %s2798_s2, %s2259_s18  ;;  %p2263_p11 = scmp.lt.u32.totalorder %s2259_s18, %s2798_s2 }
  0x3c   :  { %p2265_p12 = pnand %p2263_p11, %p2260_p10 }
  0x3e   :  { %2268 = shalt.err (!%p2265_p12)
}
  0x3f   :  { %s2269_s9 = scalar_lea.vmem %s36_s3, 16  ;;  %s2273_s30 = scalar_lea.vmem %s36_s3, 32 }
  0x40   :  { %p2270_p13 = scmp.ne.s32.totalorder %s36_s3, %s2269_s9  ;;  %p2274_p0 = scmp.lt.s32.totalorder %s36_s3, %s36_s3 }
  0x41   :  { %p2275_p1 = scmp.lt.s32.totalorder %s2273_s30, %s2269_s9 }
  0x43   :  { %p2276_p2 = por %p2275_p1, %p2274_p0 }
  0x45   :  { %p2277_p3 = pnand %p2276_p2, %p2270_p13 }
  0x47   :  { %2280 = shalt.err (!%p2277_p3)
}
  0x48   :  { %38 = dma.hbm_to_vmem [thread:$0]  %s2798_s2, 16, %s36_s3, [#allocation3]  }
  0x49   :  { %s2281_s27 = scalar_lea.hbm %s2800_s4, 512 }
  0x4a   :  { %p2282_p4 = scmp.ne.s32.totalorder %s2800_s4, %s2281_s27  ;;  %p2285_p5 = scmp.lt.u32.totalorder %s2281_s27, %s2800_s4 }
  0x4c   :  { %p2287_p6 = pnand %p2285_p5, %p2282_p4 }
  0x4e   :  { %2290 = shalt.err (!%p2287_p6)
}
  0x4f   :  { %s2291_s18 = scalar_lea.vmem %s55_s29, 512  ;;  %p2296_p8 = scmp.lt.s32.totalorder %s55_s29, %s55_s29 }
  0x50   :  { %p2292_p7 = scmp.ne.s32.totalorder %s55_s29, %s2291_s18  ;;  %p2297_p9 = scmp.lt.s32.totalorder %s2291_s18, %s2291_s18 }
  0x52   :  { %p2298_p10 = por %p2297_p9, %p2296_p8 }
  0x54   :  { %p2299_p11 = pnand %p2298_p10, %p2292_p7 }
  0x56   :  { %2302 = shalt.err (!%p2299_p11)
}
  0x57   :  { %s2386_s2 = smov 128   ;;  %s2387_s3 = smov 8  }
  0x58   :  { %60 = dma.hbm_to_vmem [thread:$0]  %s2800_s4, 512, %s55_s29, [#allocation6], %s2386_s2, %s2386_s2, %s2387_s3  }
  0x59   :  { %s2388_s23 = smov [#allocation10]   ;;  %s2389_s9 = smov [#allocation13]  }
  0x5a   :  { %s80_s24 = sshll.u32 %s2388_s23, 4  ;;  %s106_s30 = sshll.u32 %s2389_s9, 4  ;;  %s81_s24 = int_to_ptr.vmem [resolvable:$true] %s80_s24  ;;  %s107_s30 = int_to_ptr.vmem [resolvable:$true] %s106_s30 }
  0x5b   :  { %s2303_s21 = scalar_lea.hbm %s2804_s8, 1024 }
  0x5c   :  { %p2304_p12 = scmp.ne.s32.totalorder %s2804_s8, %s2303_s21  ;;  %p2307_p13 = scmp.lt.u32.totalorder %s2303_s21, %s2804_s8 }
  0x5e   :  { %p2309_p0 = pnand %p2307_p13, %p2304_p12 }
  0x60   :  { %2312 = shalt.err (!%p2309_p0)
}
  0x61   :  { %s2313_s4 = scalar_lea.vmem %s81_s24, 1024  ;;  %p2318_p2 = scmp.lt.s32.totalorder %s81_s24, %s81_s24 }
  0x62   :  { %p2314_p1 = scmp.ne.s32.totalorder %s81_s24, %s2313_s4  ;;  %p2319_p3 = scmp.lt.s32.totalorder %s2313_s4, %s2313_s4 }
  0x64   :  { %p2320_p4 = por %p2319_p3, %p2318_p2 }
  0x66   :  { %p2321_p5 = pnand %p2320_p4, %p2314_p1 }
  0x68   :  { %2324 = shalt.err (!%p2321_p5)
}
  0x69   :  { %86 = dma.hbm_to_vmem [thread:$0]  %s2804_s8, 1024, %s81_s24, [#allocation9], %s2386_s2, %s2386_s2, %s2387_s3  }
  0x6a   :  { %s2325_s20 = scalar_lea.hbm %s2807_s11, 512 }
  0x6b   :  { %p2326_p6 = scmp.ne.s32.totalorder %s2807_s11, %s2325_s20  ;;  %p2329_p7 = scmp.lt.u32.totalorder %s2325_s20, %s2807_s11 }
  0x6d   :  { %p2331_p8 = pnand %p2329_p7, %p2326_p6 }
  0x6f   :  { %2334 = shalt.err (!%p2331_p8)
}
  0x70   :  { %s2335_s5 = scalar_lea.vmem %s107_s30, 512  ;;  %p2340_p10 = scmp.lt.s32.totalorder %s107_s30, %s107_s30 }
  0x71   :  { %p2336_p9 = scmp.ne.s32.totalorder %s107_s30, %s2335_s5  ;;  %p2341_p11 = scmp.lt.s32.totalorder %s2335_s5, %s2335_s5 }
  0x73   :  { %p2342_p12 = por %p2341_p11, %p2340_p10 }
  0x75   :  { %p2343_p13 = pnand %p2342_p12, %p2336_p9 }
  0x77   :  { %2346 = shalt.err (!%p2343_p13)
}
  0x78   :  { %112 = dma.hbm_to_vmem [thread:$0]  %s2807_s11, 512, %s107_s30, [#allocation12], %s2386_s2, %s2386_s2, %s2387_s3  }
  0x79   :  { %2369 = dma.done.wait [#allocation3], 16  }
  0x7a   :  { %2370 = vsyncadd [#allocation3], 4294967280 }
  0x7b   :  { %2371 = dma.done.wait [#allocation6], 528  }
  0x7c   :  { %2372 = vsyncadd [#allocation6], 4294966768 }
  0x7d   :  { %2373 = dma.done.wait [#allocation9], 1040  }
  0x7e   :  { %2374 = vsyncadd [#allocation9], 4294966256 }
  0x7f   :  { %2375 = dma.done.wait [#allocation12], 544  }
  0x80   :  { %2376 = vsyncadd [#allocation12], 4294966752  ;;  %v2390_v0 = vmov 0   ;;  %v150_v1 = vld [vmem:[%s2796_s0 + $0x10] sm:$0xff]  ;;  %v148_v2 = vld [vmem:[%s2796_s0] sm:$0xff]  ;;  %vm211_vm0 = vcmask 523264  }
  0x81   :  { %2190 = vset.pattern.permute.xlu1 %v2390_v0  ;;  %2189 = vset.pattern.permute.xlu0 %v2390_v0  ;;  %v151_v3 = vld [vmem:[%s2796_s0 + $0x18] sm:$0xff]  ;;  %v149_v4 = vld [vmem:[%s2796_s0 + $0x8] sm:$0xff]  ;;  %v152_v6 = vld [vmem:[%s2796_s0 + $0x20] sm:$0xff]  ;;  %vm383_vm1 = vcmask 261120   ;;  %vm2392_vm2 = vmmov 0   ;;  %vm1586_vm3 = vcmask 125952  }
  0x82   :  { %169 = vperm.xlu1 %2190, %v150_v1   ;;  %159 = vperm.xlu0 %2189, %v148_v2   ;;  %v153_v5 = vld [vmem:[%s2796_s0 + $0x28] sm:$0xff]  ;;  %v155_v7 = vld [vmem:[%s2796_s0 + $0x38] sm:$0xff]  ;;  %v154_v8 = vld [vmem:[%s2796_s0 + $0x30] sm:$0xff] }
  0x83   :  { %v2595_v9 = vld [vmem:[%s2797_s1] sm:$0xff]  ;;  %v2605_v31 = vld [vmem:[%s2797_s1 + $0x8] sm:$0xff]  ;;  %v2610_v32 = vld [vmem:[%s2797_s1 + $0x10] sm:$0xff] }
  0x84   :  { %1852 = vmatprep.mubr.msk.f32.mxu0 %vm211_vm0, %v2595_v9  ;;  %v1628_v12 = vld [vmem:[#allocation2] ss:$0 sm:$0xff]  ;;  %v2619_v33 = vld [vmem:[%s2797_s1 + $0x18] sm:$0xff]  ;;  %v2633_v35 = vld [vmem:[%s2797_s1 + $0x28] sm:$0xff] }
  0x85   :  { %v2624_v34 = vld [vmem:[%s2797_s1 + $0x20] sm:$0xff]  ;;  %v2638_v36 = vld [vmem:[%s2797_s1 + $0x30] sm:$0xff]  ;;  %v2647_v37 = vld [vmem:[%s2797_s1 + $0x38] sm:$0xff] }
  0x86   :  { %174 = vperm.xlu1 %2190, %v151_v3   ;;  %164 = vperm.xlu0 %2189, %v149_v4   ;;  %v372_v38 = vld [vmem:[#allocation7] sm:$0xff]  ;;  %v373_v39 = vld [vmem:[#allocation7 + $0x8] sm:$0xff]  ;;  %v374_v41 = vld [vmem:[#allocation7 + $0x10] sm:$0xff] }
  0x87   :  { %v2077_v40 = vpack.c.bf16 %v373_v39, %v372_v38  ;;  %v375_v42 = vld [vmem:[#allocation7 + $0x18] sm:$0xff] }
  0x88   :  { %v2081_v43 = vpack.c.bf16 %v375_v42, %v374_v41  ;;  %v1637_v45 = vld [vmem:[#allocation5] ss:$0 sm:$0xff] }
  0x89   :  { %2078 = vmatprep.subr.bf16.mxu1 %v2077_v40 }
  0x8a   :  { %184 = vperm.xlu1 %2190, %v153_v5   ;;  %179 = vperm.xlu0 %2189, %v152_v6  }
  0x8b   :  { %2080 = vmatpush3.bf16.msra.mxu1 %v2077_v40 }
  0x8c   :  { %2082 = vmatprep.subr.bf16.mxu1 %v2081_v43 }
  0x8e   :  { %194 = vperm.xlu1 %2190, %v155_v7   ;;  %189 = vperm.xlu0 %2189, %v154_v8  }
  0x8f   :  { %2084 = vmatpush3.bf16.msra.mxu1 %v2081_v43 }
 0x101   :  { %v170_v10 = vpop.permute.xlu1 %169  ;;  %v160_v11 = vpop.permute.xlu0 %159 }
 0x102   :  { %v205_v15 = vmul.f32 %v1628_v12, %v170_v10  ;;  %v203_v16 = vmul.f32 %v1628_v12, %v160_v11 }
 0x105   :  { %v175_v13 = vpop.permute.xlu1 %174  ;;  %v165_v14 = vpop.permute.xlu0 %164 }
 0x106   :  { %v206_v17 = vmul.f32 %v1628_v12, %v175_v13  ;;  %v204_v18 = vmul.f32 %v1628_v12, %v165_v14  ;;  %v634_v14 = vld [vmem:[%s2802_s6] sm:$0xff] }
 0x108   :  { %v2061_v19 = vpack.c.bf16 %v204_v18, %v203_v16  ;;  %v2065_v22 = vpack.c.bf16 %v206_v17, %v205_v15 }
 0x109   :  { %v185_v20 = vpop.permute.xlu1 %184  ;;  %v180_v21 = vpop.permute.xlu0 %179 }
 0x10a   :  { %v208_v23 = vmul.f32 %v1628_v12, %v185_v20  ;;  %v207_v24 = vmul.f32 %v1628_v12, %v180_v21  ;;  %2062 = vmatprep.subr.bf16.mxu0 %v2061_v19  ;;  %v1638_v20 = vld [vmem:[#allocation8] ss:$0 sm:$0xff] }
 0x10b   :  { %2064 = vmatpush3.bf16.msra.mxu0 %v2061_v19 }
 0x10c   :  { %2066 = vmatprep.subr.bf16.mxu0 %v2065_v22  ;;  %v2069_v27 = vpack.c.bf16 %v208_v23, %v207_v24 }
 0x10d   :  { %v195_v25 = vpop.permute.xlu1 %194  ;;  %v190_v26 = vpop.permute.xlu0 %189 }
 0x10e   :  { %v210_v28 = vmul.f32 %v1628_v12, %v195_v25  ;;  %v2599_v29 = vmul.f32 %v1628_v12, %v190_v26 }
 0x10f   :  { %2068 = vmatpush3.bf16.msra.mxu0 %v2065_v22 }
 0x110   :  { %2070 = vmatprep.subr.bf16.mxu0 %v2069_v27  ;;  %v2073_v30 = vpack.c.bf16 %v210_v28, %v2599_v29 }
 0x113   :  { %2072 = vmatpush3.bf16.msra.mxu0 %v2069_v27 }
 0x114   :  { %2074 = vmatprep.subr.bf16.mxu0 %v2073_v30 }
 0x117   :  { %2076 = vmatpush3.bf16.msra.mxu0 %v2073_v30 }
 0x11a   :  { %1853 = vmatmul.mubr.msk.f32.vlgmr.msra.gmra.mrb[0].mxu0 %vm211_vm0, %v2605_v31 }
 0x11b   :  { %1855 = vmatprep.mubr.msk.f32.mxu0 %vm211_vm0, %v2610_v32 }
 0x11e   :  { %1856 = vmatmul.mubr.msk.f32.gmra.mrb[2].mxu0 %vm211_vm0, %v2619_v33 }
 0x11f   :  { %1858 = vmatprep.mubr.msk.f32.mxu0 %vm211_vm0, %v2624_v34 }
 0x122   :  { %1859 = vmatmul.mubr.msk.f32.gmra.mrb[4].mxu0 %vm211_vm0, %v2633_v35 }
 0x123   :  { %1861 = vmatprep.mubr.msk.f32.mxu0 %vm211_vm0, %v2638_v36 }
 0x126   :  { %1862 = vmatmul.mubr.msk.f32.gmra.mrb[6].mxu0 %vm211_vm0, %v2647_v37 }
 0x1ed   :  { %v1854_v44 = vpop.f32.mrb[0].mxu0 }
 0x1ee   :  { %v342_v46 = vadd.f32 %v1854_v44, %v204_v18  ;;  %v302_v47 = vpop.f32.mrb[1].mxu0  ;;  %v637_v18 = vld [vmem:[%s2802_s6 + $0x18] sm:$0xff] }
 0x1ef   :  { %v341_v48 = vadd.f32 %v302_v47, %v203_v16  ;;  %v636_v16 = vld [vmem:[%s2802_s6 + $0x10] sm:$0xff] }
 0x1f0   :  { %v357_v49 = vadd.f32 %v1637_v45, %v342_v46  ;;  %v2105_v19 = vpack.c.bf16 %v637_v18, %v636_v16 }
 0x1f1   :  { %v1857_v50 = vpop.f32.mrb[2].mxu0  ;;  %v356_v51 = vadd.f32 %v1637_v45, %v341_v48 }
 0x1f2   :  { %v344_v52 = vadd.f32 %v1857_v50, %v206_v17  ;;  %v312_v53 = vpop.f32.mrb[3].mxu0  ;;  %v365_v56 = vmax.f32 %v357_v49, 0.0 }
 0x1f3   :  { %v343_v54 = vadd.f32 %v312_v53, %v205_v15  ;;  %v364_v55 = vmax.f32 %v356_v51, 0.0  ;;  %v635_v15 = vld [vmem:[%s2802_s6 + $0x8] sm:$0xff] }
 0x1f4   :  { %v359_v57 = vadd.f32 %v1637_v45, %v344_v52  ;;  %v2101_v17 = vpack.c.bf16 %v635_v15, %v634_v14  ;;  %v1655_v15 = vld [vmem:[%s2803_s7] ss:$0 sm:$0xff] }
 0x1f5   :  { %v358_v58 = vadd.f32 %v1637_v45, %v343_v54  ;;  %v1860_v59 = vpop.f32.mrb[4].mxu0  ;;  %1872 = vmatprep.mubr.msk.f32.mxu1 %vm383_vm1, %v364_v55 }
 0x1f6   :  { %v346_v60 = vadd.f32 %v1860_v59, %v208_v23  ;;  %v322_v61 = vpop.f32.mrb[5].mxu0  ;;  %1873 = vmatmul.mubr.msk.f32.vlgmr.msra.gmra.mrb[0].mxu1 %vm383_vm1, %v365_v56  ;;  %v367_v0 = vmax.f32 %v359_v57, 0.0  ;;  %2102 = vmatprep.subr.bf16.mxu0 %v2101_v17  ;;  %v782_v56 = vld [vmem:[#allocation10] sm:$0xff]  ;;  %v783_v57 = vld [vmem:[#allocation10 + $0x8] sm:$0xff] }
 0x1f7   :  { %v366_v62 = vmax.f32 %v358_v58, 0.0  ;;  %v345_v63 = vadd.f32 %v322_v61, %v207_v24  ;;  %2104 = vmatpush3.bf16.msra.mxu0 %v2101_v17  ;;  %v784_v58 = vld [vmem:[#allocation10 + $0x10] sm:$0xff]  ;;  %v2109_v59 = vpack.c.bf16 %v783_v57, %v782_v56 }
 0x1f8   :  { %v361_v1 = vadd.f32 %v1637_v45, %v346_v60  ;;  %2106 = vmatprep.subr.bf16.mxu0 %v2105_v19  ;;  %v785_v60 = vld [vmem:[#allocation10 + $0x18] sm:$0xff] }
 0x1f9   :  { %v360_v2 = vadd.f32 %v1637_v45, %v345_v63  ;;  %v1863_v3 = vpop.f32.mrb[6].mxu0  ;;  %1875 = vmatprep.mubr.msk.f32.mxu1 %vm383_vm1, %v366_v62  ;;  %v2113_v61 = vpack.c.bf16 %v785_v60, %v784_v58 }
 0x1fa   :  { %v348_v4 = vadd.f32 %v1863_v3, %v210_v28  ;;  %v332_v5 = vpop.f32.mrb[7].mxu0  ;;  %1876 = vmatmul.mubr.msk.f32.gmra.mrb[2].mxu1 %vm383_vm1, %v367_v0  ;;  %v369_v8 = vmax.f32 %v361_v1, 0.0 }
 0x1fb   :  { %v368_v6 = vmax.f32 %v360_v2, 0.0  ;;  %v347_v7 = vadd.f32 %v332_v5, %v2599_v29  ;;  %2108 = vmatpush3.bf16.msra.mxu0 %v2105_v19 }
 0x1fc   :  { %v363_v10 = vadd.f32 %v1637_v45, %v348_v4 }
 0x1fd   :  { %v362_v11 = vadd.f32 %v1637_v45, %v347_v7  ;;  %1878 = vmatprep.mubr.msk.f32.mxu1 %vm383_vm1, %v368_v6 }
 0x1fe   :  { %1879 = vmatmul.mubr.msk.f32.gmra.mrb[4].mxu1 %vm383_vm1, %v369_v8  ;;  %v371_v13 = vmax.f32 %v363_v10, 0.0 }
 0x1ff   :  { %v370_v12 = vmax.f32 %v362_v11, 0.0 }
 0x201   :  { %1881 = vmatprep.mubr.msk.f32.mxu1 %vm383_vm1, %v370_v12 }
 0x202   :  { %1882 = vmatmul.mubr.msk.f32.gmra.mrb[6].mxu1 %vm383_vm1, %v371_v13 }
 0x203   :  { %1900 = vmatprep.mubr.msk.f32.mxu1 %vm211_vm0, %v2595_v9 }
 0x2c9   :  { %v1874_v21 = vpop.f32.mrb[0].mxu1 }
 0x2ca   :  { %v480_v22 = vadd.f32 %v1874_v21, %v1638_v20  ;;  %v474_v23 = vpop.f32.mrb[1].mxu1 }
 0x2cb   :  { %v475_v24 = vadd.f32 %v1638_v20, %v474_v23 }
 0x2cc   :  { %v514_v25 = vmax.f32 %v480_v22, 0.0 }
 0x2cd   :  { %v513_v26 = vmax.f32 %v475_v24, 0.0  ;;  %v1877_v27 = vpop.f32.mrb[2].mxu1 }
 0x2ce   :  { %v490_v28 = vadd.f32 %v1877_v27, %v1638_v20  ;;  %v484_v29 = vpop.f32.mrb[3].mxu1 }
 0x2cf   :  { %v2085_v30 = vpack.c.bf16 %v514_v25, %v513_v26  ;;  %v485_v38 = vadd.f32 %v1638_v20, %v484_v29 }
 0x2d0   :  { %v516_v39 = vmax.f32 %v490_v28, 0.0 }
 0x2d1   :  { %v515_v40 = vmax.f32 %v485_v38, 0.0  ;;  %v1880_v41 = vpop.f32.mrb[4].mxu1  ;;  %2086 = vmatprep.subr.bf16.mxu1 %v2085_v30 }
 0x2d2   :  { %v500_v42 = vadd.f32 %v1880_v41, %v1638_v20  ;;  %v494_v43 = vpop.f32.mrb[5].mxu1  ;;  %2088 = vmatpush3.bf16.msra.mxu1 %v2085_v30 }
 0x2d3   :  { %v2089_v44 = vpack.c.bf16 %v516_v39, %v515_v40  ;;  %v495_v45 = vadd.f32 %v1638_v20, %v494_v43 }
 0x2d4   :  { %v518_v46 = vmax.f32 %v500_v42, 0.0 }
 0x2d5   :  { %v517_v47 = vmax.f32 %v495_v45, 0.0  ;;  %v1883_v48 = vpop.f32.mrb[6].mxu1  ;;  %2090 = vmatprep.subr.bf16.mxu1 %v2089_v44 }
 0x2d6   :  { %v510_v49 = vadd.f32 %v1883_v48, %v1638_v20  ;;  %v504_v50 = vpop.f32.mrb[7].mxu1  ;;  %2092 = vmatpush3.bf16.msra.mxu1 %v2089_v44  ;;  %v1683_v48 = vld [vmem:[%s2802_s6 + $0x30] sm:$0xff] }
 0x2d7   :  { %v2093_v51 = vpack.c.bf16 %v518_v46, %v517_v47  ;;  %v505_v52 = vadd.f32 %v1638_v20, %v504_v50  ;;  %v1684_v50 = vld [vmem:[%s2802_s6 + $0x38] sm:$0xff] }
 0x2d8   :  { %v520_v53 = vmax.f32 %v510_v49, 0.0 }
 0x2d9   :  { %v519_v54 = vmax.f32 %v505_v52, 0.0  ;;  %2094 = vmatprep.subr.bf16.mxu1 %v2093_v51  ;;  %v1664_v52 = vld [vmem:[#allocation11] ss:$0 sm:$0xff] }
 0x2da   :  { %2096 = vmatpush3.bf16.msra.mxu1 %v2093_v51  ;;  %v2137_v51 = vpack.c.bf16 %v1684_v50, %v1683_v48 }
 0x2db   :  { %v2097_v55 = vpack.c.bf16 %v520_v53, %v519_v54 }
 0x2dd   :  { %2098 = vmatprep.subr.bf16.mxu1 %v2097_v55 }
 0x2de   :  { %2100 = vmatpush3.bf16.msra.mxu1 %v2097_v55 }
 0x2df   :  { %2110 = vmatprep.subr.bf16.mxu1 %v2109_v59 }
 0x2e1   :  { %1901 = vmatmul.mubr.msk.f32.vlgmr.msra.gmra.mrb[8].mxu1 %vm211_vm0, %v2605_v31 }
 0x2e2   :  { %1903 = vmatprep.mubr.msk.f32.mxu1 %vm211_vm0, %v2610_v32  ;;  %2112 = vmatpush3.bf16.msra.mxu1 %v2109_v59 }
 0x2e3   :  { %2114 = vmatprep.subr.bf16.mxu1 %v2113_v61 }
 0x2e5   :  { %1904 = vmatmul.mubr.msk.f32.gmra.mrb[10].mxu1 %vm211_vm0, %v2619_v33 }
 0x2e6   :  { %1906 = vmatprep.mubr.msk.f32.mxu1 %vm211_vm0, %v2624_v34  ;;  %2116 = vmatpush3.bf16.msra.mxu1 %v2113_v61 }
 0x2e9   :  { %1907 = vmatmul.mubr.msk.f32.gmra.mrb[12].mxu1 %vm211_vm0, %v2633_v35 }
 0x2ea   :  { %1909 = vmatprep.mubr.msk.f32.mxu1 %vm211_vm0, %v2638_v36 }
 0x2ed   :  { %1910 = vmatmul.mubr.msk.f32.gmra.mrb[14].mxu1 %vm211_vm0, %v2647_v37 }
 0x3b4   :  { %v1902_v62 = vpop.f32.mrb[8].mxu1 }
 0x3b5   :  { %v587_v63 = vpop.f32.mrb[9].mxu1  ;;  %v627_v1 = vadd.f32 %v1902_v62, %v514_v25 }
 0x3b6   :  { %v626_v0 = vadd.f32 %v587_v63, %v513_v26 }
 0x3b8   :  { %v1905_v2 = vpop.f32.mrb[10].mxu1  ;;  %1920 = vmatprep.mubr.msk.f32.mxu0 %vm383_vm1, %v626_v0 }
 0x3b9   :  { %v597_v3 = vpop.f32.mrb[11].mxu1  ;;  %1921 = vmatmul.mubr.msk.f32.vlgmr.msra.gmra.mrb[8].mxu0 %vm383_vm1, %v627_v1  ;;  %v629_v5 = vadd.f32 %v1905_v2, %v516_v39 }
 0x3ba   :  { %v628_v4 = vadd.f32 %v597_v3, %v515_v40 }
 0x3bc   :  { %v1908_v6 = vpop.f32.mrb[12].mxu1  ;;  %1923 = vmatprep.mubr.msk.f32.mxu0 %vm383_vm1, %v628_v4 }
 0x3bd   :  { %v607_v7 = vpop.f32.mrb[13].mxu1  ;;  %1924 = vmatmul.mubr.msk.f32.gmra.mrb[10].mxu0 %vm383_vm1, %v629_v5  ;;  %v631_v10 = vadd.f32 %v1908_v6, %v518_v46  ;;  %v1681_v46 = vld [vmem:[%s2802_s6 + $0x20] sm:$0xff] }
 0x3be   :  { %v630_v8 = vadd.f32 %v607_v7, %v517_v47  ;;  %v1682_v47 = vld [vmem:[%s2802_s6 + $0x28] sm:$0xff] }
 0x3bf   :  { %v2133_v49 = vpack.c.bf16 %v1682_v47, %v1681_v46 }
 0x3c0   :  { %v1911_v11 = vpop.f32.mrb[14].mxu1  ;;  %1926 = vmatprep.mubr.msk.f32.mxu0 %vm383_vm1, %v630_v8 }
 0x3c1   :  { %v617_v12 = vpop.f32.mrb[15].mxu1  ;;  %1927 = vmatmul.mubr.msk.f32.gmra.mrb[12].mxu0 %vm383_vm1, %v631_v10  ;;  %v633_v14 = vadd.f32 %v1911_v11, %v520_v53  ;;  %2134 = vmatprep.subr.bf16.mxu1 %v2133_v49 }
 0x3c2   :  { %v632_v13 = vadd.f32 %v617_v12, %v519_v54 }
 0x3c4   :  { %1929 = vmatprep.mubr.msk.f32.mxu0 %vm383_vm1, %v632_v13 }
 0x3c5   :  { %1930 = vmatmul.mubr.msk.f32.gmra.mrb[14].mxu0 %vm383_vm1, %v633_v14 }
 0x3c6   :  { %1968 = vmatprep.mubr.msk.f32.mxu0 %vm211_vm0, %v2595_v9 }
 0x48c   :  { %v1922_v16 = vpop.f32.mrb[8].mxu0 }
 0x48d   :  { %v741_v17 = vadd.f32 %v1922_v16, %v1655_v15  ;;  %v735_v18 = vpop.f32.mrb[9].mxu0 }
 0x48e   :  { %v736_v19 = vadd.f32 %v1655_v15, %v735_v18  ;;  %v1194_v18 = vld [vmem:[#allocation10 + $0x20] sm:$0xff] }
 0x48f   :  { %v775_v22 = vmax.f32 %v741_v17, 0.0 }
 0x490   :  { %v774_v20 = vmax.f32 %v736_v19, 0.0  ;;  %v1925_v21 = vpop.f32.mrb[10].mxu0  ;;  %v1196_v19 = vld [vmem:[#allocation10 + $0x30] sm:$0xff] }
 0x491   :  { %v751_v23 = vadd.f32 %v1925_v21, %v1655_v15  ;;  %v745_v24 = vpop.f32.mrb[11].mxu0 }
 0x492   :  { %v746_v25 = vadd.f32 %v1655_v15, %v745_v24  ;;  %1940 = vmatprep.mubr.msk.f32.mxu1 %vm383_vm1, %v774_v20 }
 0x493   :  { %1941 = vmatmul.mubr.msk.f32.vlgmr.msra.gmra.mrb[16].mxu1 %vm383_vm1, %v775_v22  ;;  %v777_v27 = vmax.f32 %v751_v23, 0.0 }
 0x494   :  { %v776_v26 = vmax.f32 %v746_v25, 0.0  ;;  %v1928_v9 = vpop.f32.mrb[12].mxu0  ;;  %2136 = vmatpush3.bf16.msra.mxu1 %v2133_v49 }
 0x495   :  { %v761_v28 = vadd.f32 %v1928_v9, %v1655_v15  ;;  %v755_v29 = vpop.f32.mrb[13].mxu0  ;;  %2138 = vmatprep.subr.bf16.mxu1 %v2137_v51 }
 0x496   :  { %v756_v30 = vadd.f32 %v1655_v15, %v755_v29  ;;  %1943 = vmatprep.mubr.msk.f32.mxu1 %vm383_vm1, %v776_v26 }
 0x497   :  { %1944 = vmatmul.mubr.msk.f32.gmra.mrb[18].mxu1 %vm383_vm1, %v777_v27  ;;  %v779_v40 = vmax.f32 %v761_v28, 0.0 }
 0x498   :  { %v778_v38 = vmax.f32 %v756_v30, 0.0  ;;  %v1931_v39 = vpop.f32.mrb[14].mxu0  ;;  %2140 = vmatpush3.bf16.msra.mxu1 %v2137_v51 }
 0x499   :  { %v771_v41 = vadd.f32 %v1931_v39, %v1655_v15  ;;  %v765_v42 = vpop.f32.mrb[15].mxu0  ;;  %v1686_v39 = vld [vmem:[%s2803_s7 + $0x1] ss:$0 sm:$0xff] }
 0x49a   :  { %v766_v43 = vadd.f32 %v1655_v15, %v765_v42  ;;  %1946 = vmatprep.mubr.msk.f32.mxu1 %vm383_vm1, %v778_v38 }
 0x49b   :  { %1947 = vmatmul.mubr.msk.f32.gmra.mrb[20].mxu1 %vm383_vm1, %v779_v40  ;;  %v781_v45 = vmax.f32 %v771_v41, 0.0 }
 0x49c   :  { %v780_v44 = vmax.f32 %v766_v43, 0.0 }
 0x49e   :  { %1949 = vmatprep.mubr.msk.f32.mxu1 %vm383_vm1, %v780_v44 }
 0x49f   :  { %1950 = vmatmul.mubr.msk.f32.gmra.mrb[22].mxu1 %vm383_vm1, %v781_v45 }
 0x566   :  { %v1942_v53 = vpop.f32.mrb[16].mxu1 }
 0x567   :  { %v889_v54 = vadd.f32 %v1942_v53, %v1664_v52  ;;  %v883_v55 = vpop.f32.mrb[17].mxu1 }
 0x568   :  { %v884_v56 = vadd.f32 %v1664_v52, %v883_v55 }
 0x569   :  { %v923_v57 = vmax.f32 %v889_v54, 0.0 }
 0x56a   :  { %v922_v58 = vmax.f32 %v884_v56, 0.0  ;;  %v1945_v59 = vpop.f32.mrb[18].mxu1 }
 0x56b   :  { %v899_v60 = vadd.f32 %v1945_v59, %v1664_v52  ;;  %v893_v61 = vpop.f32.mrb[19].mxu1 }
 0x56c   :  { %v2117_v62 = vpack.c.bf16 %v923_v57, %v922_v58  ;;  %v894_v63 = vadd.f32 %v1664_v52, %v893_v61 }
 0x56d   :  { %v925_v0 = vmax.f32 %v899_v60, 0.0 }
 0x56e   :  { %v924_v1 = vmax.f32 %v894_v63, 0.0  ;;  %v1948_v2 = vpop.f32.mrb[20].mxu1  ;;  %2118 = vmatprep.subr.bf16.mxu0 %v2117_v62 }
 0x56f   :  { %v909_v3 = vadd.f32 %v1948_v2, %v1664_v52  ;;  %v903_v4 = vpop.f32.mrb[21].mxu1  ;;  %2120 = vmatpush3.bf16.msra.mxu0 %v2117_v62  ;;  %v1417_v2 = vld [vmem:[#allocation13] sm:$0xff] }
 0x570   :  { %v2121_v5 = vpack.c.bf16 %v925_v0, %v924_v1  ;;  %v904_v6 = vadd.f32 %v1664_v52, %v903_v4  ;;  %v1419_v4 = vld [vmem:[#allocation13 + $0x10] sm:$0xff] }
 0x571   :  { %v927_v7 = vmax.f32 %v909_v3, 0.0  ;;  %v1418_v3 = vld [vmem:[#allocation13 + $0x8] sm:$0xff] }
 0x572   :  { %v926_v8 = vmax.f32 %v904_v6, 0.0  ;;  %v1951_v10 = vpop.f32.mrb[22].mxu1  ;;  %2122 = vmatprep.subr.bf16.mxu0 %v2121_v5  ;;  %v1420_v6 = vld [vmem:[#allocation13 + $0x18] sm:$0xff] }
 0x573   :  { %v919_v11 = vadd.f32 %v1951_v10, %v1664_v52  ;;  %v913_v12 = vpop.f32.mrb[23].mxu1  ;;  %2124 = vmatpush3.bf16.msra.mxu0 %v2121_v5  ;;  %v2162_v5 = vpack.c.bf16 %v1418_v3, %v1417_v2 }
 0x574   :  { %v2125_v13 = vpack.c.bf16 %v927_v7, %v926_v8  ;;  %v914_v14 = vadd.f32 %v1664_v52, %v913_v12 }
 0x575   :  { %v929_v15 = vmax.f32 %v919_v11, 0.0 }
 0x576   :  { %v928_v16 = vmax.f32 %v914_v14, 0.0  ;;  %2126 = vmatprep.subr.bf16.mxu0 %v2125_v13 }
 0x577   :  { %2128 = vmatpush3.bf16.msra.mxu0 %v2125_v13 }
 0x578   :  { %v2129_v17 = vpack.c.bf16 %v929_v15, %v928_v16 }
 0x57a   :  { %2130 = vmatprep.subr.bf16.mxu0 %v2129_v17 }
 0x57b   :  { %2132 = vmatpush3.bf16.msra.mxu0 %v2129_v17 }
 0x57e   :  { %1969 = vmatmul.mubr.msk.f32.vlgmr.msra.gmra.mrb[16].mxu0 %vm211_vm0, %v2605_v31  ;;  %v1195_v31 = vld [vmem:[#allocation10 + $0x28] sm:$0xff] }
 0x57f   :  { %1971 = vmatprep.mubr.msk.f32.mxu0 %vm211_vm0, %v2610_v32  ;;  %v2141_v20 = vpack.c.bf16 %v1195_v31, %v1194_v18  ;;  %v1197_v32 = vld [vmem:[#allocation10 + $0x38] sm:$0xff] }
 0x580   :  { %v2145_v21 = vpack.c.bf16 %v1197_v32, %v1196_v19 }
 0x581   :  { %2142 = vmatprep.subr.bf16.mxu0 %v2141_v20 }
 0x582   :  { %1972 = vmatmul.mubr.msk.f32.gmra.mrb[18].mxu0 %vm211_vm0, %v2619_v33 }
 0x583   :  { %1974 = vmatprep.mubr.msk.f32.mxu0 %vm211_vm0, %v2624_v34  ;;  %2144 = vmatpush3.bf16.msra.mxu0 %v2141_v20 }
 0x584   :  { %2146 = vmatprep.subr.bf16.mxu0 %v2145_v21 }
 0x586   :  { %1975 = vmatmul.mubr.msk.f32.gmra.mrb[20].mxu0 %vm211_vm0, %v2633_v35 }
 0x587   :  { %1977 = vmatprep.mubr.msk.f32.mxu0 %vm211_vm0, %v2638_v36  ;;  %2148 = vmatpush3.bf16.msra.mxu0 %v2145_v21 }
 0x58a   :  { %1978 = vmatmul.mubr.msk.f32.gmra.mrb[22].mxu0 %vm211_vm0, %v2647_v37 }
 0x651   :  { %v1970_v33 = vpop.f32.mrb[16].mxu0 }
 0x652   :  { %v996_v34 = vpop.f32.mrb[17].mxu0  ;;  %v1036_v35 = vadd.f32 %v1970_v33, %v923_v57 }
 0x653   :  { %v1035_v22 = vadd.f32 %v996_v34, %v922_v58 }
 0x655   :  { %v1973_v23 = vpop.f32.mrb[18].mxu0  ;;  %1988 = vmatprep.mubr.msk.f32.mxu1 %vm383_vm1, %v1035_v22 }
 0x656   :  { %v1006_v36 = vpop.f32.mrb[19].mxu0  ;;  %1989 = vmatmul.mubr.msk.f32.vlgmr.msra.gmra.mrb[24].mxu1 %vm383_vm1, %v1036_v35  ;;  %v1038_v24 = vadd.f32 %v1973_v23, %v925_v0  ;;  %v2391_v0 = vmov 0.0|0.0  }
 0x657   :  { %v1037_v37 = vadd.f32 %v1006_v36, %v924_v1  ;;  %2149 = vmatprep.subr.bf16.mxu1 %v2391_v0  ;;  %2161 = vmatprep.subr.bf16.mxu0 %v2391_v0  ;;  %v2393_v1 = vmov 0.0  }
 0x659   :  { %v1976_v25 = vpop.f32.mrb[20].mxu0  ;;  %1991 = vmatprep.mubr.msk.f32.mxu1 %vm383_vm1, %v1037_v37 }
 0x65a   :  { %v1016_v26 = vpop.f32.mrb[21].mxu0  ;;  %1992 = vmatmul.mubr.msk.f32.gmra.mrb[26].mxu1 %vm383_vm1, %v1038_v24  ;;  %v1040_v27 = vadd.f32 %v1976_v25, %v927_v7  ;;  %v2165_v7 = vpack.c.bf16 %v1420_v6, %v1419_v4 }
 0x65b   :  { %v1039_v9 = vadd.f32 %v1016_v26, %v926_v8  ;;  %v1695_v8 = vld [vmem:[#allocation11 + $0x1] ss:$0 sm:$0xff] }
 0x65d   :  { %v1979_v28 = vpop.f32.mrb[22].mxu0  ;;  %1994 = vmatprep.mubr.msk.f32.mxu1 %vm383_vm1, %v1039_v9 }
 0x65e   :  { %v1026_v29 = vpop.f32.mrb[23].mxu0  ;;  %1995 = vmatmul.mubr.msk.f32.gmra.mrb[28].mxu1 %vm383_vm1, %v1040_v27  ;;  %v1042_v38 = vadd.f32 %v1979_v28, %v929_v15 }
 0x65f   :  { %v1041_v30 = vadd.f32 %v1026_v29, %v928_v16 }
 0x661   :  { %1997 = vmatprep.mubr.msk.f32.mxu1 %vm383_vm1, %v1041_v30  ;;  %v1343_v30 = vld [vmem:[%s2806_s10] sm:$0xf] }
 0x662   :  { %1998 = vmatmul.mubr.msk.f32.gmra.mrb[30].mxu1 %vm383_vm1, %v1042_v38  ;;  %v1502_v38 = vld [vmem:[%s2809_s13] sm:$0xff] }
 0x663   :  { %2036 = vmatprep.mubr.msk.f32.mxu1 %vm2392_vm2, %v2393_v1 }
 0x729   :  { %v1990_v40 = vpop.f32.mrb[24].mxu1 }
 0x72a   :  { %v1152_v41 = vadd.f32 %v1990_v40, %v1686_v39  ;;  %v1146_v42 = vpop.f32.mrb[25].mxu1 }
 0x72b   :  { %v1147_v43 = vadd.f32 %v1686_v39, %v1146_v42 }
 0x72c   :  { %v1186_v46 = vmax.f32 %v1152_v41, 0.0 }
 0x72d   :  { %v1185_v44 = vmax.f32 %v1147_v43, 0.0  ;;  %v1993_v45 = vpop.f32.mrb[26].mxu1  ;;  %v1504_v43 = vld [vmem:[%s2809_s13 + $0x10] sm:$0xff] }
 0x72e   :  { %v1162_v47 = vadd.f32 %v1993_v45, %v1686_v39  ;;  %v1156_v48 = vpop.f32.mrb[27].mxu1 }
 0x72f   :  { %v1157_v49 = vadd.f32 %v1686_v39, %v1156_v48  ;;  %2008 = vmatprep.mubr.msk.f32.mxu0 %vm383_vm1, %v1185_v44  ;;  %v1505_v44 = vld [vmem:[%s2809_s13 + $0x18] sm:$0xff] }
 0x730   :  { %2009 = vmatmul.mubr.msk.f32.vlgmr.msra.gmra.mrb[24].mxu0 %vm383_vm1, %v1186_v46  ;;  %v1188_v52 = vmax.f32 %v1162_v47, 0.0  ;;  %v2171_v45 = vpack.c.bf16 %v1505_v44, %v1504_v43  ;;  %v1705_v46 = vld [vmem:[%s2808_s12] ss:$0 sm:$0xff]  ;;  %s2394_s12 = smov [#allocation14]  }
 0x731   :  { %v1187_v50 = vmax.f32 %v1157_v49, 0.0  ;;  %v1996_v51 = vpop.f32.mrb[28].mxu1  ;;  %2163 = vmatpush3.bf16.msra.mxu0 %v2162_v5 }
 0x732   :  { %v1172_v53 = vadd.f32 %v1996_v51, %v1686_v39  ;;  %v1166_v54 = vpop.f32.mrb[29].mxu1  ;;  %2164 = vmatprep.subr.bf16.mxu0 %v2391_v0  ;;  %v1707_v51 = vld [vmem:[%s2810_s14] ss:$0 sm:$0xff] }
 0x733   :  { %v1167_v55 = vadd.f32 %v1686_v39, %v1166_v54  ;;  %2011 = vmatprep.mubr.msk.f32.mxu0 %vm383_vm1, %v1187_v50 }
 0x734   :  { %2012 = vmatmul.mubr.msk.f32.gmra.mrb[26].mxu0 %vm383_vm1, %v1188_v52  ;;  %v1190_v58 = vmax.f32 %v1172_v53, 0.0 }
 0x735   :  { %v1189_v56 = vmax.f32 %v1167_v55, 0.0  ;;  %v1999_v57 = vpop.f32.mrb[30].mxu1  ;;  %2166 = vmatpush3.bf16.msra.mxu0 %v2165_v7 }
 0x736   :  { %v1182_v59 = vadd.f32 %v1999_v57, %v1686_v39  ;;  %v1176_v60 = vpop.f32.mrb[31].mxu1 }
 0x737   :  { %v1177_v61 = vadd.f32 %v1686_v39, %v1176_v60  ;;  %2014 = vmatprep.mubr.msk.f32.mxu0 %vm383_vm1, %v1189_v56  ;;  %v1503_v39 = vld [vmem:[%s2809_s13 + $0x8] sm:$0xff]  ;;  %s1616_s13 = sshll.u32 %s2394_s12, 4  ;;  %s1617_s13 = int_to_ptr.vmem [resolvable:$true] %s1616_s13 }
 0x738   :  { %2015 = vmatmul.mubr.msk.f32.gmra.mrb[28].mxu0 %vm383_vm1, %v1190_v58  ;;  %v1192_v63 = vmax.f32 %v1182_v59, 0.0  ;;  %v2168_v40 = vpack.c.bf16 %v1503_v39, %v1502_v38  ;;  %s2347_s14 = scalar_lea.vmem %s1617_s13, 64  ;;  %p2352_p1 = scmp.lt.s32.totalorder %s1617_s13, %s1617_s13 }
 0x739   :  { %v1191_v62 = vmax.f32 %v1177_v61, 0.0  ;;  %p2348_p0 = scmp.ne.s32.totalorder %s1617_s13, %s2347_s14  ;;  %p2353_p2 = scmp.lt.s32.totalorder %s2347_s14, %s2347_s14 }
 0x73b   :  { %2017 = vmatprep.mubr.msk.f32.mxu0 %vm383_vm1, %v1191_v62  ;;  %p2354_p3 = por %p2353_p2, %p2352_p1 }
 0x73c   :  { %2018 = vmatmul.mubr.msk.f32.gmra.mrb[30].mxu0 %vm383_vm1, %v1192_v63 }
 0x73d   :  { %2047 = vmatprep.mubr.msk.f32.mxu0 %vm2392_vm2, %v2393_v1  ;;  %p2355_p4 = pnand %p2354_p3, %p2348_p0 }
 0x803   :  { %v2010_v10 = vpop.f32.mrb[24].mxu0 }
 0x804   :  { %v1302_v11 = vadd.f32 %v2010_v10, %v1695_v8  ;;  %v1296_v12 = vpop.f32.mrb[25].mxu0 }
 0x805   :  { %v1297_v13 = vadd.f32 %v1695_v8, %v1296_v12 }
 0x806   :  { %v1336_v14 = vmax.f32 %v1302_v11, 0.0 }
 0x807   :  { %v1335_v15 = vmax.f32 %v1297_v13, 0.0  ;;  %v2013_v16 = vpop.f32.mrb[26].mxu0 }
 0x808   :  { %v1312_v17 = vadd.f32 %v2013_v16, %v1695_v8  ;;  %v1306_v18 = vpop.f32.mrb[27].mxu0 }
 0x809   :  { %v2150_v31 = vpack.c.bf16 %v1336_v14, %v1335_v15  ;;  %v1307_v19 = vadd.f32 %v1695_v8, %v1306_v18 }
 0x80a   :  { %v1338_v20 = vmax.f32 %v1312_v17, 0.0 }
 0x80b   :  { %v1337_v32 = vmax.f32 %v1307_v19, 0.0  ;;  %v2016_v21 = vpop.f32.mrb[28].mxu0  ;;  %2151 = vmatpush3.bf16.msra.mxu1 %v2150_v31 }
 0x80c   :  { %v1322_v33 = vadd.f32 %v2016_v21, %v1695_v8  ;;  %v1316_v34 = vpop.f32.mrb[29].mxu0  ;;  %2152 = vmatprep.subr.bf16.mxu1 %v2391_v0 }
 0x80d   :  { %v2153_v22 = vpack.c.bf16 %v1338_v20, %v1337_v32  ;;  %v1317_v35 = vadd.f32 %v1695_v8, %v1316_v34 }
 0x80e   :  { %v1340_v23 = vmax.f32 %v1322_v33, 0.0 }
 0x80f   :  { %v1339_v36 = vmax.f32 %v1317_v35, 0.0  ;;  %v2019_v37 = vpop.f32.mrb[30].mxu0  ;;  %2154 = vmatpush3.bf16.msra.mxu1 %v2153_v22 }
 0x810   :  { %v1332_v24 = vadd.f32 %v2019_v37, %v1695_v8  ;;  %v1326_v25 = vpop.f32.mrb[31].mxu0  ;;  %2155 = vmatprep.subr.bf16.mxu1 %v2391_v0 }
 0x811   :  { %v2156_v26 = vpack.c.bf16 %v1340_v23, %v1339_v36  ;;  %v1327_v9 = vadd.f32 %v1695_v8, %v1326_v25 }
 0x812   :  { %v1342_v27 = vmax.f32 %v1332_v24, 0.0 }
 0x813   :  { %v1341_v28 = vmax.f32 %v1327_v9, 0.0  ;;  %2157 = vmatpush3.bf16.msra.mxu1 %v2156_v26 }
 0x814   :  { %2158 = vmatprep.subr.bf16.mxu1 %v2391_v0 }
 0x815   :  { %v2159_v29 = vpack.c.bf16 %v1342_v27, %v1341_v28 }
 0x817   :  { %2160 = vmatpush3.bf16.msra.mxu1 %v2159_v29 }
 0x818   :  { %2167 = vmatprep.subr.bf16.mxu1 %v2391_v0 }
 0x81a   :  { %2037 = vmatmul.mubr.msk.f32.vlgmr.msra.gmra.mrb[32].mxu1 %vm211_vm0, %v1343_v30 }
 0x81b   :  { %2058 = vmatprep.mubr.msk.f32.mxu1 %vm2392_vm2, %v2393_v1  ;;  %2169 = vmatpush3.bf16.msra.mxu1 %v2168_v40 }
 0x81c   :  { %2170 = vmatprep.subr.bf16.mxu1 %v2391_v0 }
 0x81f   :  { %2172 = vmatpush3.bf16.msra.mxu1 %v2171_v45 }
 0x8ed   :  { %v1413_v41 = vpop.f32.mrb[32].mxu1 }
 0x8ee   :  { %v2038_v42 = vpop.f32.mrb[33].mxu1  ;;  %2048 = vmatmul.mubr.msk.f32.vlgmr.msra.gmra.mrb[32].mxu0 %vm383_vm1, %v1413_v41 }
 0x9c1   :  { %v1497_v47 = vpop.f32.mrb[32].mxu0 }
 0x9c2   :  { %v1498_v48 = vadd.f32 %v1705_v46, %v1497_v47  ;;  %v2049_v49 = vpop.f32.mrb[33].mxu0 }
 0x9c4   :  { %v1501_v50 = vmax.f32 %v1498_v48, 0.0 }
 0x9c6   :  { %2059 = vmatmul.mubr.msk.f32.vlgmr.msra.gmra.mrb[34].mxu1 %vm383_vm1, %v1501_v50 }
 0xa99   :  { %v1582_v52 = vpop.f32.mrb[34].mxu1 }
 0xa9a   :  { %v1583_v53 = vadd.f32 %v1707_v51, %v1582_v52  ;;  %v2060_v54 = vpop.f32.mrb[35].mxu1 }
 0xa9c   :  { %v1587_v55 = vsel %vm1586_vm3, %v1583_v53, 0.0 }
 0xa9d   :  { %v1588_v56 = vrot.slane %v1587_v55, 4 }
 0xa9f   :  { %v1589_v57 = vadd.f32 %v1588_v56, %v1587_v55 }
 0xaa1   :  { %v1590_v58 = vrot.slane %v1589_v57, 2 }
 0xaa3   :  { %v1591_v59 = vadd.f32 %v1590_v58, %v1589_v57 }
 0xaa5   :  { %v1592_v60 = vrot.slane %v1591_v59, 1 }
 0xaa7   :  { %v1593_v61 = vadd.f32 %v1592_v60, %v1591_v59 }
 0xaa9   :  { %v1595_v62 = vmul.f32 0.25, %v1593_v61 }
 0xaab   :  { %v1596_v63 = vsub.f32 %v1583_v53, %v1595_v62 }
 0xaad   :  { %v1597_v0 = vmul.f32 %v1596_v63, %v1596_v63 }
 0xaaf   :  { %v1598_v1 = vsel %vm1586_vm3, %v1597_v0, 0.0 }
 0xab0   :  { %v1599_v2 = vrot.slane %v1598_v1, 4 }
 0xab2   :  { %v1600_v3 = vadd.f32 %v1599_v2, %v1598_v1 }
 0xab4   :  { %v1601_v4 = vrot.slane %v1600_v3, 2 }
 0xab6   :  { %v1602_v5 = vadd.f32 %v1601_v4, %v1600_v3 }
 0xab8   :  { %v1603_v6 = vrot.slane %v1602_v5, 1 }
 0xaba   :  { %v1604_v7 = vadd.f32 %v1603_v6, %v1602_v5 }
 0xabc   :  { %v1605_v8 = vmul.f32 0.25, %v1604_v7 }
 0xabe   :  { %v1606_v10 = vadd.f32 1e-05, %v1605_v8 }
 0xac0   :  { %2191 = vrsqrt.f32 %v1606_v10 }
 0xaca   :  { %v2192_v11 = vpop.eup %2191 }
 0xacb   :  { %v1608_v12 = vmul.f32 %v2192_v11, %v1596_v63 }
 0xacd   :  { %1609 = vst.msk [vmem:[#allocation14] sm:$0xf] %vm1586_vm3, %v1608_v12 }
 0xace   :  { %2358 = shalt.err (!%p2355_p4)
}
 0xacf   :  { %s2359_s9 = scalar_lea.hbm %s2811_s15, 64 }
 0xad0   :  { %p2360_p5 = scmp.ne.s32.totalorder %s2811_s15, %s2359_s9  ;;  %p2363_p6 = scmp.lt.u32.totalorder %s2359_s9, %s2811_s15 }
 0xad2   :  { %p2365_p7 = pnand %p2363_p6, %p2360_p5 }
 0xad4   :  { %2368 = shalt.err (!%p2365_p7)
}
 0xad5   :  { %1619 = dma.vmem_to_hbm [thread:$0]  %s1617_s13, 64, %s2811_s15, [#allocation4]  }
 0xad6   :  { %2377 = dma.done.wait [#allocation4], 64  }
 0xad7   :  { %2378 = vsyncadd [#allocation4], 4294967232 }
 0xad8   :  { %1623 = vsyncpa [#allocation3], 1 }
 0xad9   :  { %1624 = vsyncpa [#allocation6], 1 }
 0xada   :  { %1625 = vsyncpa [#allocation9], 1 }
 0xadb   :  { %1626 = vsyncpa [#allocation12], 1 }
 0xadc   :  { %1627 = vsyncpa [#allocation4], 1 }

</bundles_post_ra>
